<compile_context>
chip_gen: v7x
topology: tpu7x:2x2x1
jax: 0.10.0
libtpu: 0.0.40
codegen_flags: <defaults>
</compile_context>

<pallas_src>
import jax
import jax.numpy as jnp
from jax import lax
from jax.experimental import pallas as pl
from jax.experimental.pallas import tpu as pltpu

EPS = 1e-5


def _round_up(v, m):
    return ((v + m - 1) // m) * m


# ---------------------------------------------------------------------------
# Pallas kernels
# ---------------------------------------------------------------------------
def _gram_stats_kernel(x_ref, g_ref, s_ref):
    """Accumulate G = x @ x^T (Cin_p x Cin_p) and per-row sum of x over the whole grid."""
    @pl.when(jnp.logical_and(pl.program_id(0) == 0, pl.program_id(1) == 0))
    def _init():
        g_ref[...] = jnp.zeros_like(g_ref)
        s_ref[...] = jnp.zeros_like(s_ref)

    x = x_ref[...].astype(jnp.float32)                       # (Cin_p, ts)
    # NT matmul: contract the lane (spatial) axis of both operands -> (Cin_p, Cin_p).
    g_ref[...] += lax.dot_general(x, x, (((1,), (1,)), ((), ())),
                                  preferred_element_type=jnp.float32)
    s_ref[...] += jnp.sum(x, axis=1, keepdims=True)          # (Cin_p, 1)


def _deconv_bn_relu_kernel(x_ref, w_ref, shift_ref, o_ref):
    """o = relu((scale*W) @ x + shift) for one (C4_p, ts) output tile (scale pre-folded)."""
    y = jnp.dot(w_ref[...], x_ref[...], preferred_element_type=jnp.float32)  # (C4_p, ts)
    o_ref[...] = jnp.maximum(y + shift_ref[...], 0.0).astype(o_ref.dtype)


# ---------------------------------------------------------------------------
# Wrapper
# ---------------------------------------------------------------------------
def trans_basic_conv2d(x_nchw, weight, gamma, beta, *, eps=EPS,
                       compute_dtype=jnp.float32, out_dtype=jnp.float32):
    """x:(N,Cin,H,W), weight:(Cin,Cout,2,2) [torch ConvTranspose2d layout], gamma/beta:(Cout,).
    Returns (N, Cout, 2H, 2W) NCHW in out_dtype.  Set compute_dtype/out_dtype=bf16 for
    production (halves HBM traffic; loosen numeric tolerances accordingly)."""
    N, Cin, H, W = map(int, x_nchw.shape)
    Cout = int(weight.shape[1])
    HW = H * W

    Cin_p = _round_up(Cin, 8)              # sublane-align contraction dim
    C4 = 4 * Cout                          # output rows, ordered (co, kh, kw)
    C4_p = _round_up(C4, 8)                # sublane-align output rows

    x_bytes = jnp.dtype(compute_dtype).itemsize
    o_bytes = jnp.dtype(out_dtype).itemsize

    # ---- generation-aware tile sizing ------------------------------------------------
    try:
        phys_vmem = int(pltpu.get_tpu_info().vmem_capacity_bytes)
    except Exception:
        phys_vmem = 64 << 20                                    # safe fallback (v7x size)
    budget = int(phys_vmem * 0.45)                              # working-set target
    w_res = 2 * (C4_p * Cin_p * x_bytes + C4_p * 4)             # resident weight+shift, 2 bufs
    per_col = 2 * (Cin_p * x_bytes + C4_p * o_bytes) + C4_p * 4 # x/out cols (2 bufs) + f32 temp
    avail = max(budget - w_res - (2 << 20), per_col * 128)
    ts = max(128, (avail // per_col) // 128 * 128)
    ts = min(ts, _round_up(HW, 128))
    ns = -(-HW // ts)                                           # cdiv
    ts = _round_up(-(-HW // ns), 128)                           # re-balance: minimal padding
    S_pad = ns * ts
    vmem_cap = min(int(phys_vmem * 0.78), 100 << 20)            # <=~50 MiB on v7x, <=100 MiB else
    vmem_limit = int(min(vmem_cap, max(w_res + per_col * ts + (2 << 20), 16 << 20)))

    # ---- input layout: free reshape of NCHW, zero pad (exact stats) ------------------
    x3 = x_nchw.reshape(N, Cin, HW).astype(compute_dtype)
    if Cin_p != Cin or S_pad != HW:
        x3 = jnp.pad(x3, ((0, 0), (0, Cin_p - Cin), (0, S_pad - HW)))
    x2d = x3.reshape(N * Cin_p, S_pad)

    grid = (N, ns)
    x_spec = pl.BlockSpec((Cin_p, ts), lambda n, j: (n, j))

    # ---- pass 1: Gram-matrix statistics (one read of x, ~2*M*Cin^2 flops) ------------
    g_pad, s_pad = pl.pallas_call(
        _gram_stats_kernel,
        out_shape=(jax.ShapeDtypeStruct((Cin_p, Cin_p), jnp.float32),
                   jax.ShapeDtypeStruct((Cin_p, 1), jnp.float32)),
        grid=grid,
        in_specs=[x_spec],
        out_specs=(pl.BlockSpec((Cin_p, Cin_p), lambda n, j: (0, 0)),
                   pl.BlockSpec((Cin_p, 1), lambda n, j: (0, 0))),
        compiler_params=pltpu.CompilerParams(
            dimension_semantics=("arbitrary", "arbitrary"),
            vmem_limit_bytes=vmem_limit),
        cost_estimate=pl.CostEstimate(
            flops=int(2 * N * S_pad * Cin_p * Cin_p), transcendentals=0,
            bytes_accessed=int(N * Cin_p * S_pad * x_bytes)),
    )(x2d)

    # ---- BN statistics from the Gram matrix (tiny f32 math in the wrapper) -----------
    # TODO(synk): variance still relies on f32 cancellation inside the centered Gram for
    # inputs with |mean| >> std; a fully centered scheme needs one more pass over x.
    wt = jnp.transpose(weight, (1, 2, 3, 0)).astype(jnp.float32)   # (Cout, kh, kw, Cin)
    w_st = wt.reshape(Cout, 4, Cin)
    g = g_pad[:Cin, :Cin]
    colsum = s_pad[:Cin, 0]
    m_in = jnp.float32(N * HW)                                     # true input-pixel count
    xbar = colsum / m_in
    gc = g - m_in * jnp.outer(xbar, xbar)                          # centered Gram
    col_mean = jnp.einsum('ogc,c->og', w_st, xbar)                 # per-(co,kh,kw) column mean
    mean = jnp.mean(col_mean, axis=1)                              # BN mean, (Cout,)
    col_css = jnp.einsum('ogc,cd,ogd->og', w_st, gc, w_st)         # centered sum of squares
    var = (jnp.maximum(jnp.sum(col_css, axis=1), 0.0) / (4.0 * m_in)
           + jnp.mean((col_mean - mean[:, None]) ** 2, axis=1))    # biased variance
    inv = lax.rsqrt(var + eps)
    scale = gamma.astype(jnp.float32) * inv
    shift = beta.astype(jnp.float32) - mean * scale

    # Fold BN scale into the weight; kernel only does matmul + shift + ReLU.
    w_rows = wt.reshape(C4, Cin)                                   # rows ordered (co, kh, kw)
    scale_r = jnp.repeat(scale, 4)
    shift_r = jnp.repeat(shift, 4)
    w_scaled = jnp.pad(w_rows * scale_r[:, None],
                       ((0, C4_p - C4), (0, Cin_p - Cin))).astype(compute_dtype)
    shift_col = jnp.pad(shift_r, (0, C4_p - C4)).reshape(C4_p, 1).astype(jnp.float32)

    # ---- pass 2: fused deconv + BN affine + ReLU, lane-dense (C4_p, ts) tiles --------
    out2d = pl.pallas_call(
        _deconv_bn_relu_kernel,
        out_shape=jax.ShapeDtypeStruct((N * C4_p, S_pad), out_dtype),
        grid=grid,
        in_specs=[x_spec,
                  pl.BlockSpec((C4_p, Cin_p), lambda n, j: (0, 0)),
                  pl.BlockSpec((C4_p, 1), lambda n, j: (0, 0))],
        out_specs=pl.BlockSpec((C4_p, ts), lambda n, j: (n, j)),
        compiler_params=pltpu.CompilerParams(
            dimension_semantics=("parallel", "parallel"),
            vmem_limit_bytes=vmem_limit),
        cost_estimate=pl.CostEstimate(
            flops=int(2 * N * S_pad * C4_p * Cin_p), transcendentals=0,
            bytes_accessed=int(N * Cin_p * S_pad * x_bytes + C4_p * Cin_p * x_bytes
                               + N * C4_p * S_pad * o_bytes)),
    )(x2d, w_scaled, shift_col)

    # ---- single fused slice + transpose back to NCHW ---------------------------------
    y = out2d.reshape(N, C4_p, S_pad)
    if C4_p != C4 or S_pad != HW:
        y = y[:, :C4, :HW]
    y = y.reshape(N, Cout, 2, 2, H, W)                 # (n, co, kh, kw, h, w)
    y = jnp.transpose(y, (0, 1, 4, 2, 5, 3))           # (n, co, h, kh, w, kw)
    return y.reshape(N, Cout, 2 * H, 2 * W)


# ---------------------------------------------------------------------------
# Pure-JAX reference of the torch forward (train-mode BN, biased variance)
# ---------------------------------------------------------------------------
def _reference(x_nchw, weight, gamma, beta, eps=EPS):
    N, Cin, H, W = x_nchw.shape
    Cout = weight.shape[1]
    y = jnp.einsum("nihw,iokl->nohkwl", x_nchw.astype(jnp.float32),
                   weight.astype(jnp.float32)).reshape(N, Cout, 2 * H, 2 * W)
    mean = jnp.mean(y, axis=(0, 2, 3), keepdims=True)
    var = jnp.mean((y - mean) ** 2, axis=(0, 2, 3), keepdims=True)
    y = (y - mean) * lax.rsqrt(var + eps)
    y = y * gamma.reshape(1, Cout, 1, 1) + beta.reshape(1, Cout, 1, 1)
    return jnp.maximum(y, 0.0)


if __name__ == "__main__":
    # Small deterministic setup: in_planes=4, out_planes=8, 16x16 input, batch 2.
    N, Cin, Cout, H, W = 2, 4, 8, 16, 16
    key = jax.random.PRNGKey(0)
    kx, kw, kg, kb = jax.random.split(key, 4)

    x = jax.random.normal(kx, (N, Cin, H, W), dtype=jnp.float32)
    # ConvTranspose2d weight shape: (in_planes, out_planes, kH, kW) = (4, 8, 2, 2)
    weight = jax.random.normal(kw, (Cin, Cout, 2, 2), dtype=jnp.float32) * 0.2
    gamma = 1.0 + 0.1 * jax.random.normal(kg, (Cout,), dtype=jnp.float32)
    beta = 0.1 * jax.random.normal(kb, (Cout,), dtype=jnp.float32)

    out = jax.block_until_ready(jax.jit(trans_basic_conv2d)(x, weight, gamma, beta))
    ref = jax.block_until_ready(_reference(x, weight, gamma, beta))

    assert out.shape == (N, Cout, 2 * H, 2 * W), out.shape
    err = float(jnp.max(jnp.abs(out - ref)))
    assert err < 5e-4, f"max abs err {err}"
    print("KERNEL_OK")
</pallas_src>

<mosaic_0001>
module attributes {stable_mosaic.version = 11 : i64} {
  func.func @_gram_stats_kernel(%arg0: i32, %arg1: i32, %arg2: memref<8x256xf32, #tpu.memory_space<vmem>>, %arg3: memref<8x8xf32, #tpu.memory_space<vmem>>, %arg4: memref<8x1xf32, #tpu.memory_space<vmem>>) attributes {dimension_semantics = [#tpu.dimension_semantics<arbitrary>, #tpu.dimension_semantics<arbitrary>], iteration_bounds = array<i64: 2, 1>, scalar_prefetch = 0 : i64, scratch_operands = 0 : i64, tpu.core_type = #tpu.core_type<tc>, window_params = [{transform_indices = @transform_0, window_bounds = array<i64: 8, 256>}, {pipeline_mode = #tpu.pipeline_mode<synchronous>, transform_indices = @transform_1, window_bounds = array<i64: 8, 8>}, {pipeline_mode = #tpu.pipeline_mode<synchronous>, transform_indices = @transform_2, window_bounds = array<i64: 8, 1>}]} {
    %c0_i32 = arith.constant 0 : i32
    %0 = arith.cmpi eq, %arg0, %c0_i32 : i32
    %c0_i32_0 = arith.constant 0 : i32
    %1 = arith.cmpi eq, %arg1, %c0_i32_0 : i32
    %2 = arith.andi %0, %1 : i1
    %3 = arith.extui %2 : i1 to i32
    %c0_i32_1 = arith.constant 0 : i32
    %4 = arith.cmpi ne, %3, %c0_i32_1 : i32
    scf.if %4 {
      %cst_12 = arith.constant 0.000000e+00 : f32
      %15 = vector.broadcast %cst_12 : f32 to vector<8x8xf32>
      %c0_13 = arith.constant 0 : index
      %c0_14 = arith.constant 0 : index
      %16 = vector.load %arg3[%c0_13, %c0_14] : memref<8x8xf32, #tpu.memory_space<vmem>>, vector<8x8xf32>
      tpu.vector_store %arg3[%c0_13, %c0_14], %15 {strides = array<i32>} : memref<8x8xf32, #tpu.memory_space<vmem>>, vector<8x8xf32>,
      %cst_15 = arith.constant 0.000000e+00 : f32
      %17 = vector.broadcast %cst_15 : f32 to vector<8x1xf32>
      %c0_16 = arith.constant 0 : index
      %c0_17 = arith.constant 0 : index
      %18 = vector.load %arg4[%c0_16, %c0_17] : memref<8x1xf32, #tpu.memory_space<vmem>>, vector<8x1xf32>
      tpu.vector_store %arg4[%c0_16, %c0_17], %17 {strides = array<i32>} : memref<8x1xf32, #tpu.memory_space<vmem>>, vector<8x1xf32>,
    } else {
    }
    %c0 = arith.constant 0 : index
    %c0_2 = arith.constant 0 : index
    %5 = vector.load %arg2[%c0, %c0_2] : memref<8x256xf32, #tpu.memory_space<vmem>>, vector<8x256xf32>
    %c0_3 = arith.constant 0 : index
    %c0_4 = arith.constant 0 : index
    %6 = vector.load %arg3[%c0_3, %c0_4] : memref<8x8xf32, #tpu.memory_space<vmem>>, vector<8x8xf32>
    %cst = arith.constant dense<0.000000e+00> : vector<8x8xf32>
    %7 = tpu.matmul %5, %5, %cst {dimension_numbers = #tpu.dot_dimension_numbers<[1], [1], [0], [0], [0, 0, 1, 0], [], []>} : vector<8x256xf32>, vector<8x256xf32>, vector<8x8xf32> -> vector<8x8xf32>
    %8 = arith.addf %6, %7 : vector<8x8xf32>
    %c0_5 = arith.constant 0 : index
    %c0_6 = arith.constant 0 : index
    %9 = vector.load %arg3[%c0_5, %c0_6] : memref<8x8xf32, #tpu.memory_space<vmem>>, vector<8x8xf32>
    tpu.vector_store %arg3[%c0_5, %c0_6], %8 {strides = array<i32>} : memref<8x8xf32, #tpu.memory_space<vmem>>, vector<8x8xf32>,
    %c0_7 = arith.constant 0 : index
    %c0_8 = arith.constant 0 : index
    %10 = vector.load %arg4[%c0_7, %c0_8] : memref<8x1xf32, #tpu.memory_space<vmem>>, vector<8x1xf32>
    %cst_9 = arith.constant dense<0.000000e+00> : vector<8xf32>
    %11 = vector.multi_reduction <add>, %5, %cst_9 [1] : vector<8x256xf32> to vector<8xf32>
    %12 = vector.shape_cast %11 : vector<8xf32> to vector<8x1xf32>
    %13 = arith.addf %10, %12 : vector<8x1xf32>
    %c0_10 = arith.constant 0 : index
    %c0_11 = arith.constant 0 : index
    %14 = vector.load %arg4[%c0_10, %c0_11] : memref<8x1xf32, #tpu.memory_space<vmem>>, vector<8x1xf32>
    tpu.vector_store %arg4[%c0_10, %c0_11], %13 {strides = array<i32>} : memref<8x1xf32, #tpu.memory_space<vmem>>, vector<8x1xf32>,
    return
  }
  func.func @transform_0(%arg0: i32, %arg1: i32) -> (i32, i32) {
    %c0_i32 = arith.constant 0 : i32
    return %arg0, %arg1 : i32, i32
  }
  func.func @transform_1(%arg0: i32, %arg1: i32) -> (i32, i32) {
    %c0_i32 = arith.constant 0 : i32
    %c0_i32_0 = arith.constant 0 : i32
    %c0_i32_1 = arith.constant 0 : i32
    return %c0_i32, %c0_i32_0 : i32, i32
  }
  func.func @transform_2(%arg0: i32, %arg1: i32) -> (i32, i32) {
    %c0_i32 = arith.constant 0 : i32
    %c0_i32_0 = arith.constant 0 : i32
    %c0_i32_1 = arith.constant 0 : i32
    return %c0_i32, %c0_i32_0 : i32, i32
  }
}

module attributes {stable_mosaic.version = 11 : i64} {
  func.func @_deconv_bn_relu_kernel(%arg0: i32, %arg1: i32, %arg2: memref<8x256xf32, #tpu.memory_space<vmem>>, %arg3: memref<32x8xf32, #tpu.memory_space<vmem>>, %arg4: memref<32x1xf32, #tpu.memory_space<vmem>>, %arg5: memref<32x256xf32, #tpu.memory_space<vmem>>) attributes {dimension_semantics = [#tpu.dimension_semantics<parallel>, #tpu.dimension_semantics<parallel>], iteration_bounds = array<i64: 2, 1>, scalar_prefetch = 0 : i64, scratch_operands = 0 : i64, tpu.core_type = #tpu.core_type<tc>, window_params = [{transform_indices = @transform_0, window_bounds = array<i64: 8, 256>}, {pipeline_mode = #tpu.pipeline_mode<synchronous>, transform_indices = @transform_1, window_bounds = array<i64: 32, 8>}, {pipeline_mode = #tpu.pipeline_mode<synchronous>, transform_indices = @transform_2, window_bounds = array<i64: 32, 1>}, {transform_indices = @transform_3, window_bounds = array<i64: 32, 256>}]} {
    %c0 = arith.constant 0 : index
    %c0_0 = arith.constant 0 : index
    %0 = vector.load %arg3[%c0, %c0_0] : memref<32x8xf32, #tpu.memory_space<vmem>>, vector<32x8xf32>
    %c0_1 = arith.constant 0 : index
    %c0_2 = arith.constant 0 : index
    %1 = vector.load %arg2[%c0_1, %c0_2] : memref<8x256xf32, #tpu.memory_space<vmem>>, vector<8x256xf32>
    %cst = arith.constant dense<0.000000e+00> : vector<32x256xf32>
    %2 = tpu.matmul %0, %1, %cst {dimension_numbers = #tpu.dot_dimension_numbers<[1], [0], [0], [1], [0, 0, 1, 1], [], []>} : vector<32x8xf32>, vector<8x256xf32>, vector<32x256xf32> -> vector<32x256xf32>
    %c0_3 = arith.constant 0 : index
    %c0_4 = arith.constant 0 : index
    %3 = vector.load %arg4[%c0_3, %c0_4] : memref<32x1xf32, #tpu.memory_space<vmem>>, vector<32x1xf32>
    %4 = vector.broadcast %3 : vector<32x1xf32> to vector<32x256xf32>
    %5 = arith.addf %2, %4 : vector<32x256xf32>
    %cst_5 = arith.constant 0.000000e+00 : f32
    %6 = vector.broadcast %cst_5 : f32 to vector<32x256xf32>
    %7 = arith.maximumf %5, %6 : vector<32x256xf32>
    %c0_6 = arith.constant 0 : index
    %c0_7 = arith.constant 0 : index
    %8 = vector.load %arg5[%c0_6, %c0_7] : memref<32x256xf32, #tpu.memory_space<vmem>>, vector<32x256xf32>
    tpu.vector_store %arg5[%c0_6, %c0_7], %7 {strides = array<i32>} : memref<32x256xf32, #tpu.memory_space<vmem>>, vector<32x256xf32>,
    return
  }
  func.func @transform_0(%arg0: i32, %arg1: i32) -> (i32, i32) {
    %c0_i32 = arith.constant 0 : i32
    return %arg0, %arg1 : i32, i32
  }
  func.func @transform_1(%arg0: i32, %arg1: i32) -> (i32, i32) {
    %c0_i32 = arith.constant 0 : i32
    %c0_i32_0 = arith.constant 0 : i32
    %c0_i32_1 = arith.constant 0 : i32
    return %c0_i32, %c0_i32_0 : i32, i32
  }
  func.func @transform_2(%arg0: i32, %arg1: i32) -> (i32, i32) {
    %c0_i32 = arith.constant 0 : i32
    %c0_i32_0 = arith.constant 0 : i32
    %c0_i32_1 = arith.constant 0 : i32
    return %c0_i32, %c0_i32_0 : i32, i32
  }
  func.func @transform_3(%arg0: i32, %arg1: i32) -> (i32, i32) {
    %c0_i32 = arith.constant 0 : i32
    return %arg0, %arg1 : i32, i32
  }
}

</mosaic_0001>

<bundles_post_ra>
// kernel: mul.25
= control target key start
LH: loop header
LB: loop body
LE: loop exit
PB: predicated region body
PF: predicated region fallthrough
CT: control target
= control target key end

     0   :  { %s67_s10 = smov 28   ;;  %s68_s11 = smov 20   ;;  %vm3_vm0 = vcmask 31744   ;;  %vm9_vm1 = vcmask 261344   ;;  %vm15_vm2 = vcmask 228544   ;;  %vm21_vm3 = vcmask 195744   ;;  %s111_s0 = inlined_call_operand.vmem [shape: f32[8,4], index: 0, kind: input, shape index: {}]   ;;  %s112_s1 = inlined_call_operand.vmem [shape: f32[32], index: 1, kind: output, shape index: {}]  }
   0x1   :  { %v53_v0 = vld [vmem:[%s111_s0 + $0x7] sm:$0x1]   ;;  %v55_v1 = vld [vmem:[%s111_s0 + $0x5] sm:$0x1]   ;;  %v54_v2 = vld [vmem:[%s111_s0 + $0x6] sm:$0x1]  }
   0x2   :  { %7 = vrot.lane.b32.xlu0 %v53_v0, %s67_s10  ;;  %19 = vrot.lane.b32.xlu1 %v55_v1, %s68_s11  ;;  %v56_v3 = vld [vmem:[%s111_s0 + $0x4] sm:$0x1]   ;;  %v2_v4 = vld [vmem:[%s111_s0] sm:$0x1]   ;;  %s69_s18 = smov 24   ;;  %s70_s19 = smov 16  }
   0x3   :  { %4 = vst.msk [vmem:[#allocation0] sm:$0x1] %vm3_vm0, %v2_v4   ;;  %v57_v5 = vld [vmem:[%s111_s0 + $0x3] sm:$0x1]   ;;  %v58_v6 = vld [vmem:[%s111_s0 + $0x2] sm:$0x1]  }
   0x4   :  { %s71_s24 = smov 12   ;;  %s72_s25 = smov 8   ;;  %v59_v7 = vld [vmem:[%s111_s0 + $0x1] sm:$0x1]   ;;  %vm27_vm4 = vcmask 162944   ;;  %vm33_vm5 = vcmask 130144  }
   0x5   :  { %s73_s0 = smov 4   ;;  %vm39_vm6 = vcmask 97344   ;;  %vm45_vm7 = vcmask 64544  }
   0x6   :  { %13 = vrot.lane.b32.xlu0 %v54_v2, %s69_s18  ;;  %25 = vrot.lane.b32.xlu1 %v56_v3, %s70_s19 }
   0xa   :  { %31 = vrot.lane.b32.xlu0 %v57_v5, %s71_s24  ;;  %37 = vrot.lane.b32.xlu1 %v58_v6, %s72_s25 }
   0xe   :  { %43 = vrot.lane.b32.xlu0 %v59_v7, %s73_s0 }
  0x74   :  { %v8_v8 = vpop.permute.xlu0 %7   ;;  %v20_v9 = vpop.permute.xlu1 %19  }
  0x75   :  { %10 = vst.msk [vmem:[#allocation0] sm:$0x1] %vm9_vm1, %v8_v8  }
  0x78   :  { %v14_v10 = vpop.permute.xlu0 %13   ;;  %v26_v11 = vpop.permute.xlu1 %25  }
  0x79   :  { %16 = vst.msk [vmem:[#allocation0] sm:$0x1] %vm15_vm2, %v14_v10  }
  0x7a   :  { %22 = vst.msk [vmem:[#allocation0] sm:$0x1] %vm21_vm3, %v20_v9  }
  0x7b   :  { %28 = vst.msk [vmem:[#allocation0] sm:$0x1] %vm27_vm4, %v26_v11  }
  0x7c   :  { %v32_v12 = vpop.permute.xlu0 %31   ;;  %v38_v13 = vpop.permute.xlu1 %37  }
  0x7d   :  { %34 = vst.msk [vmem:[#allocation0] sm:$0x1] %vm33_vm5, %v32_v12  }
  0x7e   :  { %40 = vst.msk [vmem:[#allocation0] sm:$0x1] %vm39_vm6, %v38_v13  }
  0x80   :  { %v44_v14 = vpop.permute.xlu0 %43  }
  0x81   :  { %46 = vst.msk [vmem:[#allocation0] sm:$0x1] %vm45_vm7, %v44_v14  }
  0x88   :  { %v50_v15 = vld [vmem:[#allocation0] sm:$0x1] }
  0x89   :  { %52 = vst [vmem:[%s112_s1] sm:$0x1] %v50_v15 }

// kernel: trans_basic_conv2d.2
= control target key start
LH: loop header
LB: loop body
LE: loop exit
PB: predicated region body
PF: predicated region fallthrough
CT: control target
= control target key end

     0   :  { %s372_s9 = smov 0   ;;  %s374_s10 = smov 0   ;;  %s420_s0 = inlined_call_operand.vmem [shape: f32[16,256], index: 0, kind: input, shape index: {}]   ;;  %s421_s1 = inlined_call_operand.vmem [shape: f32[8,8], index: 1, kind: output, shape index: {0}]   ;;  %s422_s2 = inlined_call_operand.vmem [shape: f32[8,1], index: 2, kind: output, shape index: {1}]  }
   0x1   :  { %s376_s11 = smov 0  }
   0x2 LB: > { %s25_s12 = sadd.s32 1, %s350_s10  ;;  %p299_p0 = scmp.ge.s32.totalorder %s354_s11, 1  ;;  %s354_s11 = sphi %s376_s11, %s13_s11   ;;  %s350_s10 = sphi %s374_s10, %s424_s10   ;;  %s346_s9 = sphi %s372_s9, %s423_s9  }
   0x3   : > { %p27_p1 = scmp.ge.s32.totalorder %s25_s12, 2  ;;  %p124_p2 = scmp.lt.s32.totalorder %s354_s11, 3 }
   0x5   : > { %s426_s12 = smov (%p27_p1, %s25_s12), 0  ;;  %p125_p3 = pnand %p299_p0, %p124_p2 }
   0x6   : > { %p146_p4 = scmp.lt.s32.totalorder (!%p125_p3), %s346_s9, 1  ;;  %p155_p5 = scmp.eq.s32.totalorder (!%p125_p3), %s346_s9, 0 }
   0x7   : > { %128 = sbr.rel (%p125_p3) target bundleno = 241 (0xf1), region = 24 }
   0xe   : > { %s428_s9 = smov (!%p146_p4, %s346_s9), 1  ;;  %160 = sbr.rel (!%p155_p5) target bundleno = 21 (0x15), region = 28 }
   0xf   : > { %s305_s13 = sshll.u32 %s428_s9, 4  ;;  %vm161_vm0 = vcmask (%p155_p5), 64512   ;;  %vm163_vm1 = vcmask (%p155_p5), 7168   ;;  %v356_v0 = vmov (%p155_p5), 0.0  }
  0x10   : > { %s153_s16 = scalar_lea.vmem %s420_s0, %s305_s13  ;;  %162 = vst.msk [vmem:[%s421_s1] sm:$0xff] (%p155_p5), %vm161_vm0, %v356_v0 }
  0x11   : > { %164 = vst.msk [vmem:[%s422_s2] sm:$0xff] (%p155_p5), %vm163_vm1, %v356_v0 }
  0x15 PF: > { %v166_v1 = vld [vmem:[%s153_s16 + $0x8] sm:$0xff]  ;;  %v165_v2 = vld [vmem:[%s153_s16] sm:$0xff]  ;;  %vm246_vm2 = vcmask 7168   ;;  %vm239_vm3 = vcmask 64512  }
  0x16   : > { %168 = vmatprep.subr.mxu0 %v166_v1  ;;  %232 = vmatprep.mubr.f32.mxu0 %v166_v1  ;;  %v242_v3 = vadd.f32 %v166_v1, %v165_v2 }
  0x17   : > { %169 = vmatpush1.xpose.msra.mxu0 %v165_v2  ;;  %v167_v7 = vld [vmem:[%s421_s1] sm:$0xff] }
  0x18   : > { %243 = vadd.xlane.f32.xlu0 %v242_v3  ;;  %v241_v4 = vld [vmem:[%s422_s2] sm:$0xff] }
  0x1a   : > { %233 = vmatmul.mubr.f32.vlgmr.msra.gmra.mrb[0].mxu0 %v165_v2 }
  0xa5   : > { %v244_v5 = vpop.xlane.xlu0 %243 }
  0xa6   : > { %v245_v6 = vadd.f32 %v244_v5, %v241_v4 }
  0xa8   : > { %247 = vst.msk [vmem:[%s422_s2] sm:$0xff] %vm246_vm2, %v245_v6 }
  0xed   : > { %v234_v8 = vpop.f32.mrb[0].mxu0 }
  0xee   : > { %v238_v9 = vadd.f32 %v234_v8, %v167_v7  ;;  %v236_v10 = vpop.f32.mrb[1].mxu0 }
  0xf0   : > { %240 = vst.msk [vmem:[%s421_s1] sm:$0xff] %vm239_vm3, %v238_v9 }
  0xf1 PF: > { %s13_s11 = sadd.s32 1, %s354_s11   ;;  %s423_s9 = smov %s350_s10 }
  0xf2   : > { %p10_p6 = scmp.ge.s32.totalorder %s13_s11, 4   ;;  %s424_s10 = smov %s426_s12 }
  0xf4   :  { %12 = sbr.rel (!%p10_p6) target bundleno = 2 (0x2), region = 62 }

// kernel: trans_basic_conv2d.3
= control target key start
LH: loop header
LB: loop body
LE: loop exit
PB: predicated region body
PF: predicated region fallthrough
CT: control target
= control target key end

     0   :  { %s545_s12 = smov 0   ;;  %s547_s13 = smov 0   ;;  %s611_s0 = inlined_call_operand.vmem [shape: f32[16,256], index: 0, kind: input, shape index: {}]   ;;  %s612_s1 = inlined_call_operand.vmem [shape: f32[32,8], index: 1, kind: input, shape index: {}]   ;;  %s613_s2 = inlined_call_operand.vmem [shape: f32[32,1], index: 2, kind: input, shape index: {}]   ;;  %s614_s3 = inlined_call_operand.vmem [shape: f32[64,256], index: 3, kind: output, shape index: {}]  }
   0x1   :  { %s549_s14 = smov 0  }
   0x2 LB: > { %s25_s15 = sadd.s32 1, %s517_s13  ;;  %p455_p0 = scmp.ge.s32.totalorder %s521_s14, 1  ;;  %s521_s14 = sphi %s549_s14, %s13_s14   ;;  %s517_s13 = sphi %s547_s13, %s616_s13   ;;  %s513_s12 = sphi %s545_s12, %s615_s12  }
   0x3   : > { %p27_p1 = scmp.ge.s32.totalorder %s25_s15, 2  ;;  %p158_p2 = scmp.lt.s32.totalorder %s521_s14, 3 }
   0x5   : > { %s618_s15 = smov (%p27_p1, %s25_s15), 0  ;;  %p159_p3 = pnand %p455_p0, %p158_p2 }
   0x6   : > { %p192_p4 = scmp.lt.s32.totalorder (!%p159_p3), %s513_s12, 1  ;;  %v523_v0 = vmov (!%p159_p3), 0.0   ;;  %v219_v1 = vld [vmem:[%s613_s2] sm:$0xff] (!%p159_p3)  ;;  %v221_v2 = vld [vmem:[%s613_s2 + $0x10] sm:$0xff] (!%p159_p3)  ;;  %v524_v3 = vmov (!%p159_p3), 0   ;;  %vm243_vm0 = vcmask (!%p159_p3), 64512  }
   0x7   : > { %162 = sbr.rel (%p159_p3) target bundleno = 243 (0xf3), region = 32  ;;  %320 = vmatprep.mubr.f32.mxu0 (!%p159_p3), %v523_v0  ;;  %332 = vmatprep.mubr.f32.mxu1 (!%p159_p3), %v523_v0  ;;  %v213_v4 = vld [vmem:[%s612_s1] sm:$0xff] (!%p159_p3)  ;;  %v215_v7 = vld [vmem:[%s612_s1 + $0x10] sm:$0xff] (!%p159_p3)  ;;  %v220_v8 = vld [vmem:[%s613_s2 + $0x8] sm:$0xff] (!%p159_p3)  ;;  %s458_s10 = sshll.u32 (!%p159_p3), %s513_s12, 2 }
   0x8   : > { %497 = vset.pattern.permute.xlu0 (!%p159_p3), %v524_v3  ;;  %498 = vset.pattern.permute.xlu1 (!%p159_p3), %v524_v3  ;;  %v222_v9 = vld [vmem:[%s613_s2 + $0x18] sm:$0xff] (!%p159_p3)  ;;  %v214_v10 = vld [vmem:[%s612_s1 + $0x8] sm:$0xff] (!%p159_p3)  ;;  %p203_p5 = scmp.lt.s32.totalorder (!%p159_p3), %s458_s10, 7 }
   0x9   : > { %225 = vperm.xlu0 (!%p159_p3), %497, %v219_v1   ;;  %235 = vperm.xlu1 (!%p159_p3), %498, %v221_v2   ;;  %v216_v11 = vld [vmem:[%s612_s1 + $0x18] sm:$0xff] (!%p159_p3) }
   0xd   : > { %230 = vperm.xlu0 (!%p159_p3), %497, %v220_v8   ;;  %240 = vperm.xlu1 (!%p159_p3), %498, %v222_v9  }
   0xe   : > { %s193_s20 = scalar_select %p192_p4, %s513_s12, 1 }
   0xf   : > { %s620_s10 = smov (!%p203_p5, %s458_s10), 7 }
  0x10   : > { %s467_s21 = sshll.u32 %s193_s20, 4  ;;  %s468_s11 = sshll.u32 %s620_s10, 4 }
  0x11   : > { %s199_s24 = scalar_lea.vmem %s611_s0, %s467_s21  ;;  %s210_s18 = scalar_lea.vmem %s614_s3, %s468_s11 }
  0x12   : > { %v218_v5 = vld [vmem:[%s199_s24 + $0x8] sm:$0xff]  ;;  %v217_v6 = vld [vmem:[%s199_s24] sm:$0xff] }
  0x13   : > { %256 = vmatprep.subr.mxu0 %v218_v5  ;;  %469 = vmatprep.subr.mxu1 %v218_v5 }
  0x14   : > { %257 = vmatpush1.msra.mxu0 %v217_v6  ;;  %470 = vmatpush1.msra.mxu1 %v217_v6 }
  0x15   : > { %461 = vmatmul.mubr.msk.f32.vlgmr.msra.gmra.mrb[0].mxu0 %vm243_vm0, %v213_v4  ;;  %463 = vmatmul.mubr.msk.f32.vlgmr.msra.gmra.mrb[0].mxu1 %vm243_vm0, %v215_v7 }
  0x16   : > { %326 = vmatprep.mubr.f32.mxu0 %v523_v0  ;;  %338 = vmatprep.mubr.f32.mxu1 %v523_v0 }
  0x19   : > { %462 = vmatmul.mubr.msk.f32.gmra.mrb[2].mxu0 %vm243_vm0, %v214_v10  ;;  %464 = vmatmul.mubr.msk.f32.gmra.mrb[2].mxu1 %vm243_vm0, %v216_v11 }
  0x88   : > { %v236_v12 = vpop.permute.xlu1 %235  ;;  %v226_v13 = vpop.permute.xlu0 %225 }
  0x8c   : > { %v241_v20 = vpop.permute.xlu1 %240  ;;  %v231_v22 = vpop.permute.xlu0 %230 }
  0xe8   : > { %v322_v14 = vpop.f32.mrb[0].mxu0  ;;  %v334_v15 = vpop.f32.mrb[0].mxu1 }
  0xe9   : > { %v323_v16 = vadd.f32 %v322_v14, %v226_v13  ;;  %v324_v17 = vpop.f32.mrb[1].mxu0  ;;  %v336_v18 = vpop.f32.mrb[1].mxu1  ;;  %v335_v24 = vadd.f32 %v334_v15, %v236_v12 }
  0xea   : > { %v325_v19 = vadd.f32 %v324_v17, %v226_v13  ;;  %v337_v27 = vadd.f32 %v336_v18, %v236_v12 }
  0xeb   : > { %v345_v21 = vmax.f32 %v323_v16, 0.0  ;;  %v349_v35 = vmax.f32 %v335_v24, 0.0 }
  0xec   : > { %v346_v23 = vmax.f32 %v325_v19, 0.0  ;;  %v328_v25 = vpop.f32.mrb[2].mxu0  ;;  %v340_v26 = vpop.f32.mrb[2].mxu1  ;;  %v350_v37 = vmax.f32 %v337_v27, 0.0 }
  0xed   : > { %353 = vst [vmem:[%s210_s18] sm:$0xff] %v345_v21  ;;  %v329_v28 = vadd.f32 %v328_v25, %v231_v22  ;;  %v341_v29 = vadd.f32 %v340_v26, %v241_v20  ;;  %v330_v30 = vpop.f32.mrb[3].mxu0  ;;  %v342_v31 = vpop.f32.mrb[3].mxu1  ;;  %357 = vst [vmem:[%s210_s18 + $0x20] sm:$0xff] %v349_v35 }
  0xee   : > { %354 = vst [vmem:[%s210_s18 + $0x8] sm:$0xff] %v346_v23  ;;  %v331_v32 = vadd.f32 %v330_v30, %v231_v22  ;;  %v343_v33 = vadd.f32 %v342_v31, %v241_v20  ;;  %358 = vst [vmem:[%s210_s18 + $0x28] sm:$0xff] %v350_v37 }
  0xef   : > { %v347_v34 = vmax.f32 %v329_v28, 0.0  ;;  %v351_v38 = vmax.f32 %v341_v29, 0.0 }
  0xf0   : > { %v348_v36 = vmax.f32 %v331_v32, 0.0  ;;  %v352_v39 = vmax.f32 %v343_v33, 0.0 }
  0xf1   : > { %355 = vst [vmem:[%s210_s18 + $0x10] sm:$0xff] %v347_v34  ;;  %359 = vst [vmem:[%s210_s18 + $0x30] sm:$0xff] %v351_v38 }
  0xf2   : > { %356 = vst [vmem:[%s210_s18 + $0x18] sm:$0xff] %v348_v36  ;;  %360 = vst [vmem:[%s210_s18 + $0x38] sm:$0xff] %v352_v39 }
  0xf3 PF: > { %s13_s14 = sadd.s32 1, %s521_s14   ;;  %s615_s12 = smov %s517_s13 }
  0xf4   : > { %p10_p6 = scmp.ge.s32.totalorder %s13_s14, 4   ;;  %s616_s13 = smov %s618_s15 }
  0xf6   :  { %12 = sbr.rel (!%p10_p6) target bundleno = 2 (0x2), region = 62 }

</bundles_post_ra>
